<compile_context>
chip_gen: v7x
topology: tpu7x:2x2x1
jax: 0.10.0
libtpu: 0.0.40
codegen_flags: <defaults>
</compile_context>

<pallas_src>
import math

import jax
import jax.numpy as jnp
from jax import lax
from jax.experimental import pallas as pl
from jax.experimental.pallas import tpu as pltpu


def fourier_unit_kernel(x_ref, ffwd_ref, finv_ref, wbig_ref,
                        gamma_ref, beta_ref, o_ref):
    BC, S = x_ref.shape                  # (B*C, H*W)
    Co2 = gamma_ref.shape[1]             # 2 * out_channels
    B = wbig_ref.shape[0] // Co2
    Co = Co2 // 2
    eps = 1e-5

    # ---- (1) forward 2-D DFT (ortho) as a single MXU matmul ----------------
    # z lanes: [0:S] = Re(fft2(x))[k,l], [S:2S] = Im(fft2(x))[k,l]
    z = jnp.dot(x_ref[...], ffwd_ref[...],
                preferred_element_type=jnp.float32)            # (B*C, 2S)

    # rows <- (re/im, b, c): aligned row-concat of the two lane halves
    zcat = jnp.concatenate([z[:, :S], z[:, S:]], axis=0)       # (2*B*C, S)

    # ---- (2) 1x1 conv over the 2C concat channels: one MXU matmul ----------
    # wbig is block-diagonal over the batch; output rows are (b, out_channel).
    y = jnp.dot(wbig_ref[...], zcat,
                preferred_element_type=jnp.float32)            # (B*2Co, S)

    # ---- (3) BatchNorm (training-mode batch stats) + ReLU, vectorized ------
    y3 = y.reshape(B, Co2, S)                                  # aligned view
    inv_cnt = 1.0 / (B * S)
    s1 = jnp.sum(jnp.sum(y3, axis=2, keepdims=True),
                 axis=0, keepdims=True)                        # (1, 2Co, 1)
    s2 = jnp.sum(jnp.sum(y3 * y3, axis=2, keepdims=True),
                 axis=0, keepdims=True)                        # (1, 2Co, 1)
    mean = s1 * inv_cnt
    var = s2 * inv_cnt - mean * mean                           # biased variance
    scale = gamma_ref[...] * lax.rsqrt(var + eps)              # EUP rsqrt
    shift = beta_ref[...] - mean * scale
    yn = jnp.maximum(y3 * scale + shift, 0.0)                  # (B, 2Co, S)

    # ---- (4) inverse 2-D DFT (ortho, real part) as a single MXU matmul -----
    yr = yn[:, :Co, :].reshape(B * Co, S)                      # real channels
    yi = yn[:, Co:, :].reshape(B * Co, S)                      # imag channels
    yc = jnp.concatenate([yr, yi], axis=1)                     # (B*Co, 2S)
    out = jnp.dot(yc, finv_ref[...],
                  preferred_element_type=jnp.float32)          # (B*Co, S)
    o_ref[...] = out.astype(o_ref.dtype)                       # lane-dense store


def _dft_matrices(n):
    """1-D ortho DFT factor F = C + i*S (symmetric), exact mod-n angle reduction."""
    k = jnp.arange(n)
    idx = (jnp.outer(k, k) % n).astype(jnp.float32)
    ang = (2.0 * jnp.pi / n) * idx
    scale = 1.0 / jnp.sqrt(jnp.float32(n))
    return jnp.cos(ang) * scale, -jnp.sin(ang) * scale


def fourier_unit_forward(x, conv_w, bn_gamma, bn_beta):
    """x: (B, C, H, W) f32; conv_w: (2*Co, 2*C) f32; bn_gamma/bn_beta: (2*Co,) f32."""
    B, C, H, W = x.shape
    Co2 = conv_w.shape[0]
    Co = Co2 // 2
    S = H * W

    # 2-D ortho DFT matrices, indexed [(h*W+w), (k*W+l)]; symmetric under
    # (h,w) <-> (k,l), so the same C2/S2 serve the forward and the inverse.
    Ch, Sh = _dft_matrices(H)
    Cw, Sw = _dft_matrices(W)
    C2 = (jnp.einsum('hk,wl->hwkl', Ch, Cw)
          - jnp.einsum('hk,wl->hwkl', Sh, Sw)).reshape(S, S)
    S2 = (jnp.einsum('hk,wl->hwkl', Ch, Sw)
          + jnp.einsum('hk,wl->hwkl', Sh, Cw)).reshape(S, S)
    ffwd = jnp.concatenate([C2, S2], axis=1)      # (S, 2S):  x -> [Re | Im]
    finv = jnp.concatenate([C2, S2], axis=0)      # (2S, S): [Re | Im] -> Re(ifft2)

    # Block-diagonal (over batch) 1x1-conv weight:
    #   rows = (b, out_channel), cols = (re/im, b, in_channel)  -> matches zcat.
    w4 = conv_w.astype(jnp.float32).reshape(Co2, 2, C)          # [ch, ri, c]
    wbig = jnp.einsum('xrc,bd->bxrdc', w4,
                      jnp.eye(B, dtype=jnp.float32)).reshape(B * Co2, 2 * B * C)

    gamma = bn_gamma.astype(jnp.float32).reshape(1, Co2, 1)
    beta = bn_beta.astype(jnp.float32).reshape(1, Co2, 1)

    vmem = pl.BlockSpec(memory_space=pltpu.MemorySpace.VMEM)
    out = pl.pallas_call(
        fourier_unit_kernel,
        out_shape=jax.ShapeDtypeStruct((B * Co, S), jnp.float32),
        in_specs=[vmem, vmem, vmem, vmem, vmem, vmem],
        out_specs=vmem,
    )(x.astype(jnp.float32).reshape(B * C, S), ffwd, finv, wbig, gamma, beta)

    return out.reshape(B, Co, H, W)


def fourier_unit_reference(x, conv_w, gamma, beta, eps=1e-5):
    """Pure-JAX reference mirroring the PyTorch forward (training-mode BN)."""
    ff = jnp.fft.fft2(x, norm="ortho")
    ffc = jnp.concatenate([ff.real, ff.imag], axis=1)
    y = jnp.einsum("oi,bihw->bohw", conv_w, ffc)
    m = y.mean(axis=(0, 2, 3), keepdims=True)
    v = ((y - m) ** 2).mean(axis=(0, 2, 3), keepdims=True)
    yn = (y - m) / jnp.sqrt(v + eps) * gamma[None, :, None, None] + beta[None, :, None, None]
    yn = jnp.maximum(yn, 0.0)
    half = yn.shape[1] // 2
    z = yn[:, :half] + 1j * yn[:, half:]
    return jnp.fft.ifft2(z, norm="ortho").real


if __name__ == "__main__":
    B, C, H, W = 2, 4, 16, 16
    out_channels = C

    key = jax.random.PRNGKey(0)
    kx, kw = jax.random.split(key)
    x = jax.random.normal(kx, (B, C, H, W), dtype=jnp.float32)

    # Conv2d(in=2C, out=2Co, k=1, bias=False): kaiming-uniform-like init, deterministic.
    fan_in = 2 * C
    bound = 1.0 / math.sqrt(fan_in)
    conv_w = jax.random.uniform(kw, (2 * out_channels, 2 * C),
                                minval=-bound, maxval=bound, dtype=jnp.float32)
    # BatchNorm2d(2*Co) default init: weight=1, bias=0.
    bn_gamma = jnp.ones((2 * out_channels,), jnp.float32)
    bn_beta = jnp.zeros((2 * out_channels,), jnp.float32)

    out = fourier_unit_forward(x, conv_w, bn_gamma, bn_beta)
    out = jax.block_until_ready(out)

    ref = fourier_unit_reference(x, conv_w, bn_gamma, bn_beta)
    assert out.shape == (B, out_channels, H, W)
    if not bool(jnp.allclose(out, ref, atol=3e-3, rtol=3e-3)):
        raise AssertionError("Pallas FourierUnit output mismatch vs JAX reference")

    print("KERNEL_OK")
</pallas_src>

<mosaic_0001>
module attributes {stable_mosaic.version = 11 : i64} {
  func.func @fourier_unit_kernel(%arg0: memref<8x256xf32, #tpu.memory_space<vmem>>, %arg1: memref<256x512xf32, #tpu.memory_space<vmem>>, %arg2: memref<512x256xf32, #tpu.memory_space<vmem>>, %arg3: memref<16x16xf32, #tpu.memory_space<vmem>>, %arg4: memref<1x8x1xf32, #tpu.memory_space<vmem>>, %arg5: memref<1x8x1xf32, #tpu.memory_space<vmem>>, %arg6: memref<8x256xf32, #tpu.memory_space<vmem>>) attributes {dimension_semantics = [], scalar_prefetch = 0 : i64, scratch_operands = 0 : i64, tpu.core_type = #tpu.core_type<tc>} {
    %c0 = arith.constant 0 : index
    %c0_0 = arith.constant 0 : index
    %0 = vector.load %arg0[%c0, %c0_0] : memref<8x256xf32, #tpu.memory_space<vmem>>, vector<8x256xf32>
    %c0_1 = arith.constant 0 : index
    %c0_2 = arith.constant 0 : index
    %1 = vector.load %arg1[%c0_1, %c0_2] : memref<256x512xf32, #tpu.memory_space<vmem>>, vector<256x512xf32>
    %cst = arith.constant dense<0.000000e+00> : vector<8x512xf32>
    %2 = tpu.matmul %0, %1, %cst {dimension_numbers = #tpu.dot_dimension_numbers<[1], [0], [0], [1], [0, 0, 1, 1], [], []>} : vector<8x256xf32>, vector<256x512xf32>, vector<8x512xf32> -> vector<8x512xf32>
    %3 = vector.extract_strided_slice %2 {offsets = [0, 0], sizes = [8, 256], strides = [1, 1]} : vector<8x512xf32> to vector<8x256xf32>
    %4 = vector.extract_strided_slice %2 {offsets = [0, 256], sizes = [8, 256], strides = [1, 1]} : vector<8x512xf32> to vector<8x256xf32>
    %5 = tpu.concatenate %3, %4 in 0 : vector<8x256xf32>, vector<8x256xf32> -> vector<16x256xf32>
    %c0_3 = arith.constant 0 : index
    %c0_4 = arith.constant 0 : index
    %6 = vector.load %arg3[%c0_3, %c0_4] : memref<16x16xf32, #tpu.memory_space<vmem>>, vector<16x16xf32>
    %cst_5 = arith.constant dense<0.000000e+00> : vector<16x256xf32>
    %7 = tpu.matmul %6, %5, %cst_5 {dimension_numbers = #tpu.dot_dimension_numbers<[1], [0], [0], [1], [0, 0, 1, 1], [], []>} : vector<16x16xf32>, vector<16x256xf32>, vector<16x256xf32> -> vector<16x256xf32>
    %8 = vector.shape_cast %7 : vector<16x256xf32> to vector<2x8x256xf32>
    %cst_6 = arith.constant dense<0.000000e+00> : vector<2x8xf32>
    %9 = vector.multi_reduction <add>, %8, %cst_6 [2] : vector<2x8x256xf32> to vector<2x8xf32>
    %10 = vector.shape_cast %9 : vector<2x8xf32> to vector<2x8x1xf32>
    %cst_7 = arith.constant dense<0.000000e+00> : vector<8x1xf32>
    %11 = vector.multi_reduction <add>, %10, %cst_7 [0] : vector<2x8x1xf32> to vector<8x1xf32>
    %12 = vector.shape_cast %11 : vector<8x1xf32> to vector<1x8x1xf32>
    %13 = arith.mulf %8, %8 : vector<2x8x256xf32>
    %cst_8 = arith.constant dense<0.000000e+00> : vector<2x8xf32>
    %14 = vector.multi_reduction <add>, %13, %cst_8 [2] : vector<2x8x256xf32> to vector<2x8xf32>
    %15 = vector.shape_cast %14 : vector<2x8xf32> to vector<2x8x1xf32>
    %cst_9 = arith.constant dense<0.000000e+00> : vector<8x1xf32>
    %16 = vector.multi_reduction <add>, %15, %cst_9 [0] : vector<2x8x1xf32> to vector<8x1xf32>
    %17 = vector.shape_cast %16 : vector<8x1xf32> to vector<1x8x1xf32>
    %cst_10 = arith.constant 0.001953125 : f32
    %18 = vector.broadcast %cst_10 : f32 to vector<1x8x1xf32>
    %19 = arith.mulf %12, %18 : vector<1x8x1xf32>
    %cst_11 = arith.constant 0.001953125 : f32
    %20 = vector.broadcast %cst_11 : f32 to vector<1x8x1xf32>
    %21 = arith.mulf %17, %20 : vector<1x8x1xf32>
    %22 = arith.mulf %19, %19 : vector<1x8x1xf32>
    %23 = arith.subf %21, %22 : vector<1x8x1xf32>
    %c0_12 = arith.constant 0 : index
    %c0_13 = arith.constant 0 : index
    %c0_14 = arith.constant 0 : index
    %24 = vector.load %arg4[%c0_12, %c0_13, %c0_14] : memref<1x8x1xf32, #tpu.memory_space<vmem>>, vector<1x8x1xf32>
    %cst_15 = arith.constant 9.99999974E-6 : f32
    %25 = vector.broadcast %cst_15 : f32 to vector<1x8x1xf32>
    %26 = arith.addf %23, %25 : vector<1x8x1xf32>
    %27 = math.rsqrt %26 : vector<1x8x1xf32>
    %28 = arith.mulf %24, %27 : vector<1x8x1xf32>
    %c0_16 = arith.constant 0 : index
    %c0_17 = arith.constant 0 : index
    %c0_18 = arith.constant 0 : index
    %29 = vector.load %arg5[%c0_16, %c0_17, %c0_18] : memref<1x8x1xf32, #tpu.memory_space<vmem>>, vector<1x8x1xf32>
    %30 = arith.mulf %19, %28 : vector<1x8x1xf32>
    %31 = arith.subf %29, %30 : vector<1x8x1xf32>
    %32 = vector.broadcast %28 : vector<1x8x1xf32> to vector<2x8x256xf32>
    %33 = arith.mulf %8, %32 : vector<2x8x256xf32>
    %34 = vector.broadcast %31 : vector<1x8x1xf32> to vector<2x8x256xf32>
    %35 = arith.addf %33, %34 : vector<2x8x256xf32>
    %cst_19 = arith.constant 0.000000e+00 : f32
    %36 = vector.broadcast %cst_19 : f32 to vector<2x8x256xf32>
    %37 = arith.maximumf %35, %36 : vector<2x8x256xf32>
    %38 = vector.extract_strided_slice %37 {offsets = [0, 0, 0], sizes = [2, 4, 256], strides = [1, 1, 1]} : vector<2x8x256xf32> to vector<2x4x256xf32>
    %39 = vector.shape_cast %38 : vector<2x4x256xf32> to vector<8x256xf32>
    %40 = vector.extract_strided_slice %37 {offsets = [0, 4, 0], sizes = [2, 4, 256], strides = [1, 1, 1]} : vector<2x8x256xf32> to vector<2x4x256xf32>
    %41 = vector.shape_cast %40 : vector<2x4x256xf32> to vector<8x256xf32>
    %42 = tpu.concatenate %39, %41 in 1 : vector<8x256xf32>, vector<8x256xf32> -> vector<8x512xf32>
    %c0_20 = arith.constant 0 : index
    %c0_21 = arith.constant 0 : index
    %43 = vector.load %arg2[%c0_20, %c0_21] : memref<512x256xf32, #tpu.memory_space<vmem>>, vector<512x256xf32>
    %cst_22 = arith.constant dense<0.000000e+00> : vector<8x256xf32>
    %44 = tpu.matmul %42, %43, %cst_22 {dimension_numbers = #tpu.dot_dimension_numbers<[1], [0], [0], [1], [0, 0, 1, 1], [], []>} : vector<8x512xf32>, vector<512x256xf32>, vector<8x256xf32> -> vector<8x256xf32>
    %c0_23 = arith.constant 0 : index
    %c0_24 = arith.constant 0 : index
    %45 = vector.load %arg6[%c0_23, %c0_24] : memref<8x256xf32, #tpu.memory_space<vmem>>, vector<8x256xf32>
    tpu.vector_store %arg6[%c0_23, %c0_24], %44 {strides = array<i32>} : memref<8x256xf32, #tpu.memory_space<vmem>>, vector<8x256xf32>,
    return
  }
}

</mosaic_0001>

<bundles_post_ra>
// kernel: tpu_custom_call.1
= control target key start
LH: loop header
LB: loop body
LE: loop exit
PB: predicated region body
PF: predicated region fallthrough
CT: control target
= control target key end

     0   :  { %11 = vsyncpa [#allocation3], 0  ;;  %s1287_s0 = inlined_call_operand.vmem [shape: f32[8,256], index: 0, kind: input, shape index: {}]   ;;  %s1288_s1 = inlined_call_operand.hbm [shape: f32[256,512], index: 1, kind: input, shape index: {}]   ;;  %s1289_s2 = inlined_call_operand.hbm [shape: f32[512,256], index: 2, kind: input, shape index: {}]   ;;  %s1290_s3 = inlined_call_operand.hbm [shape: f32[16,16], index: 3, kind: input, shape index: {}]   ;;  %s1291_s4 = inlined_call_operand.vmem [shape: f32[1,8,1], index: 4, kind: input, shape index: {}]   ;;  %s1292_s5 = inlined_call_operand.vmem [shape: f32[1,8,1], index: 5, kind: input, shape index: {}]   ;;  %s1293_s6 = inlined_call_operand.hbm [shape: f32[8,256], index: 6, kind: output, shape index: {}]  }
   0x1   :  { %12 = vsyncpa [#allocation6], 0 }
   0x2   :  { %13 = vsyncpa [#allocation4], 0  ;;  %s1156_s21 = smov [#allocation5]   ;;  %s1062_s25 = scalar_lea.hbm %s1289_s2, 16384 }
   0x3   :  { %s33_s22 = sshll.u32 %s1156_s21, 4  ;;  %p1063_p0 = scmp.ne.s32.totalorder %s1289_s2, %s1062_s25  ;;  %s34_s22 = int_to_ptr.vmem [resolvable:$true] %s33_s22 }
   0x4   :  { %p1066_p1 = scmp.lt.u32.totalorder %s1062_s25, %s1289_s2 }
   0x6   :  { %p1068_p2 = pnand %p1066_p1, %p1063_p0 }
   0x8   :  { %1071 = shalt.err (!%p1068_p2)
}
   0x9   :  { %s1072_s30 = scalar_lea.vmem %s34_s22, 16384  ;;  %p1077_p4 = scmp.lt.s32.totalorder %s34_s22, %s34_s22 }
   0xa   :  { %p1073_p3 = scmp.ne.s32.totalorder %s34_s22, %s1072_s30  ;;  %p1078_p5 = scmp.lt.s32.totalorder %s1072_s30, %s1072_s30 }
   0xc   :  { %p1079_p6 = por %p1078_p5, %p1077_p4 }
   0xe   :  { %p1080_p7 = pnand %p1079_p6, %p1073_p3 }
  0x10   :  { %1083 = shalt.err (!%p1080_p7)
}
  0x11   :  { %s1157_s7 = smov 256   ;;  %s1158_s8 = smov 16  }
  0x12   :  { %39 = dma.hbm_to_vmem [thread:$0]  %s1289_s2, 16384, %s34_s22, [#allocation6], %s1157_s7, %s1157_s7, %s1158_s8  }
  0x13   :  { %s1159_s11 = smov [#allocation2]   ;;  %s1084_s15 = scalar_lea.hbm %s1288_s1, 16384 }
  0x14   :  { %s21_s12 = sshll.u32 %s1159_s11, 4  ;;  %p1085_p8 = scmp.ne.s32.totalorder %s1288_s1, %s1084_s15  ;;  %s22_s12 = int_to_ptr.vmem [resolvable:$true] %s21_s12 }
  0x15   :  { %p1088_p9 = scmp.lt.u32.totalorder %s1084_s15, %s1288_s1 }
  0x17   :  { %p1090_p10 = pnand %p1088_p9, %p1085_p8 }
  0x19   :  { %1093 = shalt.err (!%p1090_p10)
}
  0x1a   :  { %s1094_s20 = scalar_lea.vmem %s22_s12, 16384  ;;  %p1099_p12 = scmp.lt.s32.totalorder %s22_s12, %s22_s12 }
  0x1b   :  { %p1095_p11 = scmp.ne.s32.totalorder %s22_s12, %s1094_s20  ;;  %p1100_p13 = scmp.lt.s32.totalorder %s1094_s20, %s1094_s20 }
  0x1d   :  { %p1101_p0 = por %p1100_p13, %p1099_p12 }
  0x1f   :  { %p1102_p1 = pnand %p1101_p0, %p1095_p11 }
  0x21   :  { %1105 = shalt.err (!%p1102_p1)
}
  0x22   :  { %s1160_s2 = smov 512   ;;  %s1161_s21 = smov 32  }
  0x23   :  { %27 = dma.hbm_to_vmem [thread:$0]  %s1288_s1, 16384, %s22_s12, [#allocation3], %s1160_s2, %s1160_s2, %s1161_s21  }
  0x24   :  { %s1162_s24 = smov [#allocation7]   ;;  %s1106_s28 = scalar_lea.hbm %s1290_s3, 256 }
  0x25   :  { %s45_s25 = sshll.u32 %s1162_s24, 4  ;;  %p1107_p2 = scmp.ne.s32.totalorder %s1290_s3, %s1106_s28  ;;  %s46_s25 = int_to_ptr.vmem [resolvable:$true] %s45_s25 }
  0x26   :  { %p1110_p3 = scmp.lt.u32.totalorder %s1106_s28, %s1290_s3 }
  0x28   :  { %p1112_p4 = pnand %p1110_p3, %p1107_p2 }
  0x2a   :  { %1115 = shalt.err (!%p1112_p4)
}
  0x2b   :  { %s1116_s9 = scalar_lea.vmem %s46_s25, 256  ;;  %p1121_p6 = scmp.lt.s32.totalorder %s46_s25, %s46_s25 }
  0x2c   :  { %p1117_p5 = scmp.ne.s32.totalorder %s46_s25, %s1116_s9  ;;  %p1122_p7 = scmp.lt.s32.totalorder %s1116_s9, %s1116_s9 }
  0x2e   :  { %p1123_p8 = por %p1122_p7, %p1121_p6 }
  0x30   :  { %p1124_p9 = pnand %p1123_p8, %p1117_p5 }
  0x32   :  { %1127 = shalt.err (!%p1124_p9)
}
  0x33   :  { %s1163_s1 = smov 128   ;;  %s1164_s10 = smov 8  }
  0x34   :  { %51 = dma.hbm_to_vmem [thread:$0]  %s1290_s3, 256, %s46_s25, [#allocation6], %s1163_s1, %s1163_s1, %s1164_s10  }
  0x35   :  { %1150 = dma.done.wait [#allocation3], 16384  }
  0x36   :  { %1151 = vsyncadd [#allocation3], 4294950912 }
  0x37   :  { %1152 = dma.done.wait [#allocation6], 16640  }
  0x38   :  { %1153 = vsyncadd [#allocation6], 4294950656  ;;  %v68_v0 = vld [vmem:[#allocation2 + $0x8] sm:$0xff]  ;;  %v70_v2 = vld [vmem:[#allocation2 + $0x18] sm:$0xff]  ;;  %vm339_vm0 = vcmask 130048  }
  0x39   :  { %v72_v1 = vld [vmem:[#allocation2 + $0x28] sm:$0xff]  ;;  %v74_v4 = vld [vmem:[#allocation2 + $0x38] sm:$0xff]  ;;  %v67_v5 = vld [vmem:[#allocation2] sm:$0xff] }
  0x3a   :  { %v784_v3 = vpack.c.bf16 %v72_v1, %v68_v0  ;;  %v71_v6 = vld [vmem:[#allocation2 + $0x20] sm:$0xff]  ;;  %v848_v7 = vpack.c.bf16 %v74_v4, %v70_v2  ;;  %v69_v9 = vld [vmem:[#allocation2 + $0x10] sm:$0xff]  ;;  %v76_v11 = vld [vmem:[#allocation2 + $0x48] sm:$0xff] }
  0x3b   :  { %v786_v8 = vpack.c.bf16 %v71_v6, %v67_v5  ;;  %v73_v10 = vld [vmem:[#allocation2 + $0x30] sm:$0xff]  ;;  %v80_v13 = vld [vmem:[#allocation2 + $0x68] sm:$0xff]  ;;  %v78_v14 = vld [vmem:[#allocation2 + $0x58] sm:$0xff] }
  0x3c   :  { %785 = vmatprep.subr.bf16.mxu0 %v784_v3  ;;  %v850_v12 = vpack.c.bf16 %v73_v10, %v69_v9  ;;  %v82_v15 = vld [vmem:[#allocation2 + $0x78] sm:$0xff]  ;;  %849 = vmatprep.subr.bf16.mxu1 %v848_v7  ;;  %v788_v16 = vpack.c.bf16 %v80_v13, %v76_v11  ;;  %v75_v18 = vld [vmem:[#allocation2 + $0x40] sm:$0xff]  ;;  %v77_v20 = vld [vmem:[#allocation2 + $0x50] sm:$0xff] }
  0x3d   :  { %787 = vmatpush1.bf16.msra.mxu0 %v786_v8  ;;  %v852_v17 = vpack.c.bf16 %v82_v15, %v78_v14  ;;  %v79_v19 = vld [vmem:[#allocation2 + $0x60] sm:$0xff]  ;;  %v81_v22 = vld [vmem:[#allocation2 + $0x70] sm:$0xff]  ;;  %v84_v23 = vld [vmem:[#allocation2 + $0x88] sm:$0xff] }
  0x3e   :  { %851 = vmatpush1.bf16.msra.mxu1 %v850_v12  ;;  %v790_v21 = vpack.c.bf16 %v79_v19, %v75_v18  ;;  %v88_v24 = vld [vmem:[#allocation2 + $0xa8] sm:$0xff]  ;;  %789 = vmatprep.subr.bf16.mxu0 %v788_v16  ;;  %v854_v25 = vpack.c.bf16 %v81_v22, %v77_v20  ;;  %v86_v27 = vld [vmem:[#allocation2 + $0x98] sm:$0xff]  ;;  %v83_v29 = vld [vmem:[#allocation2 + $0x80] sm:$0xff] }
  0x3f   :  { %853 = vmatprep.subr.bf16.mxu1 %v852_v17  ;;  %v792_v26 = vpack.c.bf16 %v88_v24, %v84_v23  ;;  %v90_v28 = vld [vmem:[#allocation2 + $0xb8] sm:$0xff]  ;;  %v87_v31 = vld [vmem:[#allocation2 + $0xa0] sm:$0xff]  ;;  %v85_v32 = vld [vmem:[#allocation2 + $0x90] sm:$0xff] }
  0x40   :  { %v856_v30 = vpack.c.bf16 %v90_v28, %v86_v27  ;;  %v89_v33 = vld [vmem:[#allocation2 + $0xb0] sm:$0xff]  ;;  %v794_v34 = vpack.c.bf16 %v87_v31, %v83_v29  ;;  %v92_v35 = vld [vmem:[#allocation2 + $0xc8] sm:$0xff]  ;;  %v94_v37 = vld [vmem:[#allocation2 + $0xd8] sm:$0xff] }
  0x41   :  { %791 = vmatpush1.bf16.msra.mxu0 %v790_v21  ;;  %v96_v36 = vld [vmem:[#allocation2 + $0xe8] sm:$0xff]  ;;  %v858_v38 = vpack.c.bf16 %v89_v33, %v85_v32  ;;  %v98_v40 = vld [vmem:[#allocation2 + $0xf8] sm:$0xff]  ;;  %v91_v41 = vld [vmem:[#allocation2 + $0xc0] sm:$0xff] }
  0x42   :  { %855 = vmatpush1.bf16.msra.mxu1 %v854_v25  ;;  %793 = vmatprep.subr.bf16.mxu0 %v792_v26  ;;  %v796_v39 = vpack.c.bf16 %v96_v36, %v92_v35  ;;  %v95_v42 = vld [vmem:[#allocation2 + $0xe0] sm:$0xff]  ;;  %v860_v43 = vpack.c.bf16 %v98_v40, %v94_v37  ;;  %v93_v44 = vld [vmem:[#allocation2 + $0xd0] sm:$0xff]  ;;  %v100_v46 = vld [vmem:[#allocation2 + $0x108] sm:$0xff] }
  0x43   :  { %857 = vmatprep.subr.bf16.mxu1 %v856_v30  ;;  %v97_v45 = vld [vmem:[#allocation2 + $0xf0] sm:$0xff]  ;;  %v104_v47 = vld [vmem:[#allocation2 + $0x128] sm:$0xff]  ;;  %v102_v48 = vld [vmem:[#allocation2 + $0x118] sm:$0xff]  ;;  %v798_v50 = vpack.c.bf16 %v95_v42, %v91_v41 }
  0x44   :  { %v106_v49 = vld [vmem:[#allocation2 + $0x138] sm:$0xff]  ;;  %v862_v51 = vpack.c.bf16 %v97_v45, %v93_v44  ;;  %v800_v52 = vpack.c.bf16 %v104_v47, %v100_v46  ;;  %v99_v53 = vld [vmem:[#allocation2 + $0x100] sm:$0xff]  ;;  %v101_v55 = vld [vmem:[#allocation2 + $0x110] sm:$0xff] }
  0x45   :  { %795 = vmatpush1.bf16.msra.mxu0 %v794_v34  ;;  %v103_v54 = vld [vmem:[#allocation2 + $0x120] sm:$0xff]  ;;  %v864_v56 = vpack.c.bf16 %v106_v49, %v102_v48  ;;  %v105_v57 = vld [vmem:[#allocation2 + $0x130] sm:$0xff]  ;;  %v108_v58 = vld [vmem:[#allocation2 + $0x148] sm:$0xff] }
  0x46   :  { %859 = vmatpush1.bf16.msra.mxu1 %v858_v38  ;;  %797 = vmatprep.subr.bf16.mxu0 %v796_v39  ;;  %v112_v59 = vld [vmem:[#allocation2 + $0x168] sm:$0xff]  ;;  %v110_v60 = vld [vmem:[#allocation2 + $0x158] sm:$0xff]  ;;  %v802_v62 = vpack.c.bf16 %v103_v54, %v99_v53  ;;  %v866_v63 = vpack.c.bf16 %v105_v57, %v101_v55  ;;  %v107_v1 = vld [vmem:[#allocation2 + $0x140] sm:$0xff] }
  0x47   :  { %861 = vmatprep.subr.bf16.mxu1 %v860_v43  ;;  %v114_v61 = vld [vmem:[#allocation2 + $0x178] sm:$0xff]  ;;  %v804_v0 = vpack.c.bf16 %v112_v59, %v108_v58  ;;  %v111_v2 = vld [vmem:[#allocation2 + $0x160] sm:$0xff]  ;;  %v109_v3 = vld [vmem:[#allocation2 + $0x150] sm:$0xff] }
  0x48   :  { %v868_v4 = vpack.c.bf16 %v114_v61, %v110_v60  ;;  %v113_v5 = vld [vmem:[#allocation2 + $0x170] sm:$0xff]  ;;  %v116_v6 = vld [vmem:[#allocation2 + $0x188] sm:$0xff]  ;;  %v118_v8 = vld [vmem:[#allocation2 + $0x198] sm:$0xff]  ;;  %v806_v10 = vpack.c.bf16 %v111_v2, %v107_v1 }
  0x49   :  { %799 = vmatpush1.bf16.msra.mxu0 %v798_v50  ;;  %v120_v7 = vld [vmem:[#allocation2 + $0x1a8] sm:$0xff]  ;;  %v122_v9 = vld [vmem:[#allocation2 + $0x1b8] sm:$0xff]  ;;  %v870_v11 = vpack.c.bf16 %v113_v5, %v109_v3  ;;  %v115_v13 = vld [vmem:[#allocation2 + $0x180] sm:$0xff] }
  0x4a   :  { %863 = vmatpush1.bf16.msra.mxu1 %v862_v51  ;;  %801 = vmatprep.subr.bf16.mxu0 %v800_v52  ;;  %v808_v12 = vpack.c.bf16 %v120_v7, %v116_v6  ;;  %v119_v14 = vld [vmem:[#allocation2 + $0x1a0] sm:$0xff]  ;;  %v117_v15 = vld [vmem:[#allocation2 + $0x190] sm:$0xff]  ;;  %v872_v16 = vpack.c.bf16 %v122_v9, %v118_v8  ;;  %v124_v18 = vld [vmem:[#allocation2 + $0x1c8] sm:$0xff] }
  0x4b   :  { %865 = vmatprep.subr.bf16.mxu1 %v864_v56  ;;  %v121_v17 = vld [vmem:[#allocation2 + $0x1b0] sm:$0xff]  ;;  %v128_v19 = vld [vmem:[#allocation2 + $0x1e8] sm:$0xff]  ;;  %v126_v20 = vld [vmem:[#allocation2 + $0x1d8] sm:$0xff]  ;;  %v810_v22 = vpack.c.bf16 %v119_v14, %v115_v13 }
  0x4c   :  { %v130_v21 = vld [vmem:[#allocation2 + $0x1f8] sm:$0xff]  ;;  %v874_v23 = vpack.c.bf16 %v121_v17, %v117_v15  ;;  %v812_v24 = vpack.c.bf16 %v128_v19, %v124_v18  ;;  %v123_v25 = vld [vmem:[#allocation2 + $0x1c0] sm:$0xff]  ;;  %v125_v27 = vld [vmem:[#allocation2 + $0x1d0] sm:$0xff] }
  0x4d   :  { %803 = vmatpush1.bf16.msra.mxu0 %v802_v62  ;;  %v127_v26 = vld [vmem:[#allocation2 + $0x1e0] sm:$0xff]  ;;  %v876_v28 = vpack.c.bf16 %v130_v21, %v126_v20  ;;  %v129_v29 = vld [vmem:[#allocation2 + $0x1f0] sm:$0xff]  ;;  %v132_v30 = vld [vmem:[#allocation2 + $0x208] sm:$0xff] }
  0x4e   :  { %867 = vmatpush1.bf16.msra.mxu1 %v866_v63  ;;  %805 = vmatprep.subr.bf16.mxu0 %v804_v0  ;;  %v136_v31 = vld [vmem:[#allocation2 + $0x228] sm:$0xff]  ;;  %v134_v32 = vld [vmem:[#allocation2 + $0x218] sm:$0xff]  ;;  %v814_v34 = vpack.c.bf16 %v127_v26, %v123_v25  ;;  %v878_v35 = vpack.c.bf16 %v129_v29, %v125_v27  ;;  %v131_v37 = vld [vmem:[#allocation2 + $0x200] sm:$0xff] }
  0x4f   :  { %869 = vmatprep.subr.bf16.mxu1 %v868_v4  ;;  %v138_v33 = vld [vmem:[#allocation2 + $0x238] sm:$0xff]  ;;  %v816_v36 = vpack.c.bf16 %v136_v31, %v132_v30  ;;  %v135_v38 = vld [vmem:[#allocation2 + $0x220] sm:$0xff]  ;;  %v133_v39 = vld [vmem:[#allocation2 + $0x210] sm:$0xff] }
  0x50   :  { %v880_v40 = vpack.c.bf16 %v138_v33, %v134_v32  ;;  %v137_v41 = vld [vmem:[#allocation2 + $0x230] sm:$0xff]  ;;  %v140_v42 = vld [vmem:[#allocation2 + $0x248] sm:$0xff]  ;;  %v142_v44 = vld [vmem:[#allocation2 + $0x258] sm:$0xff]  ;;  %v818_v46 = vpack.c.bf16 %v135_v38, %v131_v37 }
  0x51   :  { %807 = vmatpush1.bf16.msra.mxu0 %v806_v10  ;;  %v144_v43 = vld [vmem:[#allocation2 + $0x268] sm:$0xff]  ;;  %v146_v45 = vld [vmem:[#allocation2 + $0x278] sm:$0xff]  ;;  %v882_v47 = vpack.c.bf16 %v137_v41, %v133_v39  ;;  %v139_v49 = vld [vmem:[#allocation2 + $0x240] sm:$0xff] }
  0x52   :  { %871 = vmatpush1.bf16.msra.mxu1 %v870_v11  ;;  %809 = vmatprep.subr.bf16.mxu0 %v808_v12  ;;  %v820_v48 = vpack.c.bf16 %v144_v43, %v140_v42  ;;  %v143_v50 = vld [vmem:[#allocation2 + $0x260] sm:$0xff]  ;;  %v141_v51 = vld [vmem:[#allocation2 + $0x250] sm:$0xff]  ;;  %v884_v52 = vpack.c.bf16 %v146_v45, %v142_v44  ;;  %v148_v54 = vld [vmem:[#allocation2 + $0x288] sm:$0xff] }
  0x53   :  { %873 = vmatprep.subr.bf16.mxu1 %v872_v16  ;;  %v145_v53 = vld [vmem:[#allocation2 + $0x270] sm:$0xff]  ;;  %v152_v55 = vld [vmem:[#allocation2 + $0x2a8] sm:$0xff]  ;;  %v150_v56 = vld [vmem:[#allocation2 + $0x298] sm:$0xff]  ;;  %v822_v58 = vpack.c.bf16 %v143_v50, %v139_v49 }
  0x54   :  { %v154_v57 = vld [vmem:[#allocation2 + $0x2b8] sm:$0xff]  ;;  %v886_v59 = vpack.c.bf16 %v145_v53, %v141_v51  ;;  %v824_v60 = vpack.c.bf16 %v152_v55, %v148_v54  ;;  %v147_v61 = vld [vmem:[#allocation2 + $0x280] sm:$0xff]  ;;  %v149_v63 = vld [vmem:[#allocation2 + $0x290] sm:$0xff] }
  0x55   :  { %811 = vmatpush1.bf16.msra.mxu0 %v810_v22  ;;  %v151_v62 = vld [vmem:[#allocation2 + $0x2a0] sm:$0xff]  ;;  %v888_v0 = vpack.c.bf16 %v154_v57, %v150_v56  ;;  %v153_v1 = vld [vmem:[#allocation2 + $0x2b0] sm:$0xff]  ;;  %v156_v2 = vld [vmem:[#allocation2 + $0x2c8] sm:$0xff] }
  0x56   :  { %875 = vmatpush1.bf16.msra.mxu1 %v874_v23  ;;  %813 = vmatprep.subr.bf16.mxu0 %v812_v24  ;;  %v160_v3 = vld [vmem:[#allocation2 + $0x2e8] sm:$0xff]  ;;  %v158_v4 = vld [vmem:[#allocation2 + $0x2d8] sm:$0xff]  ;;  %v826_v6 = vpack.c.bf16 %v151_v62, %v147_v61  ;;  %v155_v7 = vld [vmem:[#allocation2 + $0x2c0] sm:$0xff]  ;;  %v890_v8 = vpack.c.bf16 %v153_v1, %v149_v63 }
  0x57   :  { %877 = vmatprep.subr.bf16.mxu1 %v876_v28  ;;  %v162_v5 = vld [vmem:[#allocation2 + $0x2f8] sm:$0xff]  ;;  %v828_v9 = vpack.c.bf16 %v160_v3, %v156_v2  ;;  %v159_v10 = vld [vmem:[#allocation2 + $0x2e0] sm:$0xff]  ;;  %v157_v11 = vld [vmem:[#allocation2 + $0x2d0] sm:$0xff]  ;;  %v1165_v2 = vmov 0.0  }
  0x58   :  { %v161_v12 = vld [vmem:[#allocation2 + $0x2f0] sm:$0xff]  ;;  %v892_v13 = vpack.c.bf16 %v162_v5, %v158_v4  ;;  %v164_v14 = vld [vmem:[#allocation2 + $0x308] sm:$0xff]  ;;  %v166_v17 = vld [vmem:[#allocation2 + $0x318] sm:$0xff]  ;;  %v830_v19 = vpack.c.bf16 %v159_v10, %v155_v7 }
  0x59   :  { %815 = vmatpush1.bf16.msra.mxu0 %v814_v34  ;;  %v168_v15 = vld [vmem:[#allocation2 + $0x328] sm:$0xff]  ;;  %v170_v18 = vld [vmem:[#allocation2 + $0x338] sm:$0xff]  ;;  %v894_v20 = vpack.c.bf16 %v161_v12, %v157_v11  ;;  %v163_v22 = vld [vmem:[#allocation2 + $0x300] sm:$0xff] }
  0x5a   :  { %879 = vmatpush1.bf16.msra.mxu1 %v878_v35  ;;  %817 = vmatprep.subr.bf16.mxu0 %v816_v36  ;;  %v66_v16 = vld [vmem:[%s1287_s0 + $0x8] sm:$0xff]  ;;  %v832_v21 = vpack.c.bf16 %v168_v15, %v164_v14  ;;  %v167_v23 = vld [vmem:[#allocation2 + $0x320] sm:$0xff]  ;;  %v165_v24 = vld [vmem:[#allocation2 + $0x310] sm:$0xff]  ;;  %v896_v25 = vpack.c.bf16 %v170_v18, %v166_v17 }
  0x5b   :  { %881 = vmatprep.subr.bf16.mxu1 %v880_v40  ;;  %259 = vmatprep.mubr.f32.mxu0 %v66_v16  ;;  %v169_v26 = vld [vmem:[#allocation2 + $0x330] sm:$0xff]  ;;  %v172_v27 = vld [vmem:[#allocation2 + $0x348] sm:$0xff]  ;;  %v174_v29 = vld [vmem:[#allocation2 + $0x358] sm:$0xff]  ;;  %v834_v31 = vpack.c.bf16 %v167_v23, %v163_v22  ;;  %v1166_v23 = vmov 0  }
  0x5c   :  { %330 = vmatprep.mubr.f32.mxu1 %v66_v16  ;;  %v176_v28 = vld [vmem:[#allocation2 + $0x368] sm:$0xff]  ;;  %v178_v30 = vld [vmem:[#allocation2 + $0x378] sm:$0xff]  ;;  %v898_v32 = vpack.c.bf16 %v169_v26, %v165_v24  ;;  %v171_v34 = vld [vmem:[#allocation2 + $0x340] sm:$0xff]  ;;  %1058 = vset.pattern.permute.xlu0 %v1166_v23 }
  0x5d   :  { %819 = vmatpush1.bf16.msra.mxu0 %v818_v46  ;;  %v836_v33 = vpack.c.bf16 %v176_v28, %v172_v27  ;;  %v175_v35 = vld [vmem:[#allocation2 + $0x360] sm:$0xff]  ;;  %v173_v36 = vld [vmem:[#allocation2 + $0x350] sm:$0xff]  ;;  %v900_v37 = vpack.c.bf16 %v178_v30, %v174_v29  ;;  %v180_v39 = vld [vmem:[#allocation2 + $0x388] sm:$0xff]  ;;  %1059 = vset.pattern.permute.xlu1 %v1166_v23 }
  0x5e   :  { %883 = vmatpush1.bf16.msra.mxu1 %v882_v47  ;;  %821 = vmatprep.subr.bf16.mxu0 %v820_v48  ;;  %v177_v38 = vld [vmem:[#allocation2 + $0x370] sm:$0xff]  ;;  %v184_v40 = vld [vmem:[#allocation2 + $0x3a8] sm:$0xff]  ;;  %v182_v41 = vld [vmem:[#allocation2 + $0x398] sm:$0xff]  ;;  %v838_v43 = vpack.c.bf16 %v175_v35, %v171_v34 }
  0x5f   :  { %885 = vmatprep.subr.bf16.mxu1 %v884_v52  ;;  %v186_v42 = vld [vmem:[#allocation2 + $0x3b8] sm:$0xff]  ;;  %v902_v44 = vpack.c.bf16 %v177_v38, %v173_v36  ;;  %v840_v45 = vpack.c.bf16 %v184_v40, %v180_v39  ;;  %v179_v46 = vld [vmem:[#allocation2 + $0x380] sm:$0xff]  ;;  %v181_v48 = vld [vmem:[#allocation2 + $0x390] sm:$0xff] }
  0x60   :  { %v183_v47 = vld [vmem:[#allocation2 + $0x3a0] sm:$0xff]  ;;  %v904_v49 = vpack.c.bf16 %v186_v42, %v182_v41  ;;  %v185_v50 = vld [vmem:[#allocation2 + $0x3b0] sm:$0xff]  ;;  %v188_v51 = vld [vmem:[#allocation2 + $0x3c8] sm:$0xff] }
  0x61   :  { %823 = vmatpush1.bf16.msra.mxu0 %v822_v58  ;;  %v192_v52 = vld [vmem:[#allocation2 + $0x3e8] sm:$0xff]  ;;  %v190_v53 = vld [vmem:[#allocation2 + $0x3d8] sm:$0xff]  ;;  %v842_v55 = vpack.c.bf16 %v183_v47, %v179_v46  ;;  %v906_v56 = vpack.c.bf16 %v185_v50, %v181_v48  ;;  %v187_v58 = vld [vmem:[#allocation2 + $0x3c0] sm:$0xff] }
  0x62   :  { %887 = vmatpush1.bf16.msra.mxu1 %v886_v59  ;;  %825 = vmatprep.subr.bf16.mxu0 %v824_v60  ;;  %v194_v54 = vld [vmem:[#allocation2 + $0x3f8] sm:$0xff]  ;;  %v844_v57 = vpack.c.bf16 %v192_v52, %v188_v51  ;;  %v191_v59 = vld [vmem:[#allocation2 + $0x3e0] sm:$0xff]  ;;  %v189_v61 = vld [vmem:[#allocation2 + $0x3d0] sm:$0xff] }
  0x63   :  { %889 = vmatprep.subr.bf16.mxu1 %v888_v0  ;;  %v908_v60 = vpack.c.bf16 %v194_v54, %v190_v53  ;;  %v193_v62 = vld [vmem:[#allocation2 + $0x3f0] sm:$0xff]  ;;  %v846_v63 = vpack.c.bf16 %v191_v59, %v187_v58  ;;  %v65_v1 = vld [vmem:[%s1287_s0] sm:$0xff]  ;;  %v338_v10 = vld [vmem:[#allocation7 + $0x8] sm:$0xff] }
  0x64   :  { %v910_v0 = vpack.c.bf16 %v193_v62, %v189_v61  ;;  %v491_v24 = vld [vmem:[#allocation5 + $0x8] sm:$0xff]  ;;  %v557_v28 = vld [vmem:[#allocation5 + $0x218] sm:$0xff]  ;;  %v490_v29 = vld [vmem:[#allocation5] sm:$0xff] }
  0x65   :  { %827 = vmatpush1.bf16.msra.mxu0 %v826_v6  ;;  %v555_v26 = vld [vmem:[#allocation5 + $0x208] sm:$0xff]  ;;  %v492_v30 = vld [vmem:[#allocation5 + $0x10] sm:$0xff]  ;;  %v561_v39 = vld [vmem:[#allocation5 + $0x238] sm:$0xff] }
  0x66   :  { %891 = vmatpush1.bf16.msra.mxu1 %v890_v8  ;;  %829 = vmatprep.subr.bf16.mxu0 %v828_v9  ;;  %v337_v9 = vld [vmem:[#allocation7] sm:$0xff]  ;;  %v556_v34 = vld [vmem:[#allocation5 + $0x210] sm:$0xff]  ;;  %v495_v35 = vld [vmem:[#allocation5 + $0x28] sm:$0xff] }
  0x67   :  { %893 = vmatprep.subr.bf16.mxu1 %v892_v13  ;;  %v559_v38 = vld [vmem:[#allocation5 + $0x228] sm:$0xff]  ;;  %v494_v42 = vld [vmem:[#allocation5 + $0x20] sm:$0xff]  ;;  %v560_v46 = vld [vmem:[#allocation5 + $0x230] sm:$0xff] }
  0x68   :  { %v984_v41 = vpack.c.bf16 %v561_v39, %v559_v38  ;;  %v499_v47 = vld [vmem:[#allocation5 + $0x48] sm:$0xff]  ;;  %v501_v48 = vld [vmem:[#allocation5 + $0x58] sm:$0xff]  ;;  %v498_v53 = vld [vmem:[#allocation5 + $0x40] sm:$0xff] }
  0x69   :  { %831 = vmatpush1.bf16.msra.mxu0 %v830_v19  ;;  %v924_v50 = vpack.c.bf16 %v501_v48, %v499_v47  ;;  %v563_v51 = vld [vmem:[#allocation5 + $0x248] sm:$0xff]  ;;  %v565_v52 = vld [vmem:[#allocation5 + $0x258] sm:$0xff] }
  0x6a   :  { %895 = vmatpush1.bf16.msra.mxu1 %v894_v20  ;;  %833 = vmatprep.subr.bf16.mxu0 %v832_v21  ;;  %v988_v54 = vpack.c.bf16 %v565_v52, %v563_v51  ;;  %v503_v59 = vld [vmem:[#allocation5 + $0x68] sm:$0xff]  ;;  %v513_v23 = vld [vmem:[#allocation5 + $0xb8] sm:$0xff] }
  0x6b   :  { %897 = vmatprep.subr.bf16.mxu1 %v896_v25  ;;  %v493_v25 = vld [vmem:[#allocation5 + $0x18] sm:$0xff]  ;;  %v567_v61 = vld [vmem:[#allocation5 + $0x268] sm:$0xff] }
  0x6c   :  { %v916_v27 = vpack.c.bf16 %v493_v25, %v491_v24  ;;  %v575_v24 = vld [vmem:[#allocation5 + $0x2a8] sm:$0xff]  ;;  %v577_v25 = vld [vmem:[#allocation5 + $0x2b8] sm:$0xff] }
  0x6d   :  { %835 = vmatpush1.bf16.msra.mxu0 %v834_v31  ;;  %v980_v31 = vpack.c.bf16 %v557_v28, %v555_v26  ;;  %v521_v47 = vld [vmem:[#allocation5 + $0xf8] sm:$0xff]  ;;  %v583_v48 = vld [vmem:[#allocation5 + $0x2e8] sm:$0xff] }
  0x6e   :  { %899 = vmatpush1.bf16.msra.mxu1 %v898_v32  ;;  %837 = vmatprep.subr.bf16.mxu0 %v836_v33  ;;  %v918_v32 = vpack.c.bf16 %v492_v30, %v490_v29  ;;  %v554_v33 = vld [vmem:[#allocation5 + $0x200] sm:$0xff]  ;;  %v512_v30 = vld [vmem:[#allocation5 + $0xb0] sm:$0xff] }
  0x6f   :  { %901 = vmatprep.subr.bf16.mxu1 %v900_v37  ;;  %v982_v36 = vpack.c.bf16 %v556_v34, %v554_v33  ;;  %v497_v37 = vld [vmem:[#allocation5 + $0x38] sm:$0xff]  ;;  %v510_v29 = vld [vmem:[#allocation5 + $0xa0] sm:$0xff]  ;;  %v576_v33 = vld [vmem:[#allocation5 + $0x2b0] sm:$0xff] }
  0x70   :  { %v920_v40 = vpack.c.bf16 %v497_v37, %v495_v35  ;;  %v515_v34 = vld [vmem:[#allocation5 + $0xc8] sm:$0xff]  ;;  %v517_v35 = vld [vmem:[#allocation5 + $0xd8] sm:$0xff]  ;;  %v938_v38 = vpack.c.bf16 %v512_v30, %v510_v29  ;;  %v530_v29 = vld [vmem:[#allocation5 + $0x140] sm:$0xff] }
  0x71   :  { %839 = vmatpush1.bf16.msra.mxu0 %v838_v43  ;;  %v496_v43 = vld [vmem:[#allocation5 + $0x30] sm:$0xff]  ;;  %v581_v37 = vld [vmem:[#allocation5 + $0x2d8] sm:$0xff] }
  0x72   :  { %903 = vmatpush1.bf16.msra.mxu1 %v902_v44  ;;  %841 = vmatprep.subr.bf16.mxu0 %v840_v45  ;;  %v558_v44 = vld [vmem:[#allocation5 + $0x220] sm:$0xff]  ;;  %v922_v45 = vpack.c.bf16 %v496_v43, %v494_v42  ;;  %v516_v42 = vld [vmem:[#allocation5 + $0xd0] sm:$0xff] }
  0x73   :  { %905 = vmatprep.subr.bf16.mxu1 %v904_v49  ;;  %v986_v49 = vpack.c.bf16 %v560_v46, %v558_v44  ;;  %v578_v43 = vld [vmem:[#allocation5 + $0x2c0] sm:$0xff]  ;;  %v519_v46 = vld [vmem:[#allocation5 + $0xe8] sm:$0xff]  ;;  %v532_v30 = vld [vmem:[#allocation5 + $0x150] sm:$0xff] }
  0x74   :  { %v944_v52 = vpack.c.bf16 %v521_v47, %v519_v46  ;;  %v539_v46 = vld [vmem:[#allocation5 + $0x188] sm:$0xff]  ;;  %v541_v47 = vld [vmem:[#allocation5 + $0x198] sm:$0xff] }
  0x75   :  { %843 = vmatpush1.bf16.msra.mxu0 %v842_v55  ;;  %v500_v55 = vld [vmem:[#allocation5 + $0x50] sm:$0xff] }
  0x76   :  { %907 = vmatpush1.bf16.msra.mxu1 %v906_v56  ;;  %845 = vmatprep.subr.bf16.mxu0 %v844_v57  ;;  %v562_v56 = vld [vmem:[#allocation5 + $0x240] sm:$0xff]  ;;  %v564_v57 = vld [vmem:[#allocation5 + $0x250] sm:$0xff]  ;;  %v926_v58 = vpack.c.bf16 %v500_v55, %v498_v53 }
  0x77   :  { %909 = vmatprep.subr.bf16.mxu1 %v908_v60  ;;  %v505_v60 = vld [vmem:[#allocation5 + $0x78] sm:$0xff]  ;;  %v990_v62 = vpack.c.bf16 %v564_v57, %v562_v56  ;;  %v518_v53 = vld [vmem:[#allocation5 + $0xe0] sm:$0xff]  ;;  %v584_v57 = vld [vmem:[#allocation5 + $0x2f0] sm:$0xff] }
  0x78   :  { %v582_v55 = vld [vmem:[#allocation5 + $0x2e0] sm:$0xff] }
  0x79   :  { %847 = vmatpush1.bf16.msra.mxu0 %v846_v63  ;;  %v928_v63 = vpack.c.bf16 %v505_v60, %v503_v59  ;;  %v525_v59 = vld [vmem:[#allocation5 + $0x118] sm:$0xff]  ;;  %v587_v60 = vld [vmem:[#allocation5 + $0x308] sm:$0xff] }
  0x7a   :  { %911 = vmatpush1.bf16.msra.mxu1 %v910_v0  ;;  %v569_v0 = vld [vmem:[#allocation5 + $0x278] sm:$0xff] }
  0x7b   :  { %981 = vmatprep.subr.bf16.mxu1 %v980_v31  ;;  %v574_v31 = vld [vmem:[#allocation5 + $0x2a0] sm:$0xff] }
  0x7c   :  { %260 = vmatmul.mubr.f32.vlgmr.msra.gmra.mrb[0].mxu0 %v65_v1  ;;  %v1002_v39 = vpack.c.bf16 %v576_v33, %v574_v31  ;;  %v594_v31 = vld [vmem:[#allocation5 + $0x340] sm:$0xff]  ;;  %v596_v33 = vld [vmem:[#allocation5 + $0x350] sm:$0xff] }
  0x7d   :  { %331 = vmatmul.mubr.f32.vlgmr.msra.gmra.mrb[0].mxu1 %v65_v1  ;;  %410 = vmatprep.mubr.f32.mxu0 %v1165_v2  ;;  %v502_v1 = vld [vmem:[#allocation5 + $0x60] sm:$0xff] }
  0x7e   :  { %983 = vmatpush1.bf16.msra.mxu1 %v982_v36  ;;  %v579_v36 = vld [vmem:[#allocation5 + $0x2c8] sm:$0xff] }
  0x7f   :  { %985 = vmatprep.subr.bf16.mxu1 %v984_v41  ;;  %v514_v41 = vld [vmem:[#allocation5 + $0xc0] sm:$0xff]  ;;  %v1004_v44 = vpack.c.bf16 %v581_v37, %v579_v36  ;;  %v599_v36 = vld [vmem:[#allocation5 + $0x368] sm:$0xff]  ;;  %v601_v37 = vld [vmem:[#allocation5 + $0x378] sm:$0xff] }
  0x82   :  { %987 = vmatpush1.bf16.msra.mxu1 %v986_v49  ;;  %v585_v49 = vld [vmem:[#allocation5 + $0x2f8] sm:$0xff] }
  0x83   :  { %989 = vmatprep.subr.bf16.mxu1 %v988_v54  ;;  %v520_v54 = vld [vmem:[#allocation5 + $0xf0] sm:$0xff]  ;;  %v1008_v56 = vpack.c.bf16 %v585_v49, %v583_v48  ;;  %v603_v48 = vld [vmem:[#allocation5 + $0x388] sm:$0xff]  ;;  %v605_v49 = vld [vmem:[#allocation5 + $0x398] sm:$0xff] }
  0x86   :  { %991 = vmatpush1.bf16.msra.mxu1 %v990_v62  ;;  %v946_v62 = vpack.c.bf16 %v520_v54, %v518_v53  ;;  %v538_v53 = vld [vmem:[#allocation5 + $0x180] sm:$0xff]  ;;  %v540_v54 = vld [vmem:[#allocation5 + $0x190] sm:$0xff] }
 0x14f   :  { %v261_v3 = vpop.f32.mrb[0].mxu0 }
 0x150   :  { %v332_v4 = vpop.f32.mrb[0].mxu1  ;;  %v263_v5 = vpop.f32.mrb[1].mxu0 }
 0x151   :  { %v914_v6 = vpack.c.bf16 %v332_v4, %v261_v3  ;;  %v334_v7 = vpop.f32.mrb[1].mxu1  ;;  %v992_v3 = vpack.c.bf16 %v569_v0, %v567_v61  ;;  %v566_v4 = vld [vmem:[#allocation5 + $0x260] sm:$0xff]  ;;  %v589_v61 = vld [vmem:[#allocation5 + $0x318] sm:$0xff] }
 0x152   :  { %v912_v8 = vpack.c.bf16 %v334_v7, %v263_v5  ;;  %v568_v5 = vld [vmem:[#allocation5 + $0x270] sm:$0xff]  ;;  %v509_v7 = vld [vmem:[#allocation5 + $0x98] sm:$0xff] }
 0x153   :  { %993 = vmatprep.subr.bf16.mxu1 %v992_v3  ;;  %v586_v3 = vld [vmem:[#allocation5 + $0x300] sm:$0xff] }
 0x154   :  { %913 = vmatprep.subr.bf16.mxu0 %v912_v8  ;;  %v571_v8 = vld [vmem:[#allocation5 + $0x288] sm:$0xff] }
 0x155   :  { %915 = vmatpush1.bf16.msra.mxu0 %v914_v6  ;;  %v507_v6 = vld [vmem:[#allocation5 + $0x88] sm:$0xff] }
 0x156   :  { %917 = vmatprep.subr.bf16.mxu0 %v916_v27 }
 0x158   :  { %778 = vmatmul.mubr.msk.f32.vlgmr.msra.gmra.mrb[2].mxu0 %vm339_vm0, %v337_v9  ;;  %v573_v9 = vld [vmem:[#allocation5 + $0x298] sm:$0xff] }
 0x159   :  { %416 = vmatprep.mubr.f32.mxu0 %v1165_v2  ;;  %919 = vmatpush1.bf16.msra.mxu0 %v918_v32  ;;  %v504_v2 = vld [vmem:[#allocation5 + $0x70] sm:$0xff]  ;;  %v1000_v32 = vpack.c.bf16 %v577_v25, %v575_v24  ;;  %v595_v24 = vld [vmem:[#allocation5 + $0x348] sm:$0xff]  ;;  %v597_v25 = vld [vmem:[#allocation5 + $0x358] sm:$0xff] }
 0x15a   :  { %921 = vmatprep.subr.bf16.mxu0 %v920_v40  ;;  %v940_v40 = vpack.c.bf16 %v517_v35, %v515_v34  ;;  %v535_v34 = vld [vmem:[#allocation5 + $0x168] sm:$0xff]  ;;  %v537_v35 = vld [vmem:[#allocation5 + $0x178] sm:$0xff] }
 0x15c   :  { %779 = vmatmul.mubr.msk.f32.gmra.mrb[4].mxu0 %vm339_vm0, %v338_v10  ;;  %v930_v10 = vpack.c.bf16 %v504_v2, %v502_v1  ;;  %v522_v1 = vld [vmem:[#allocation5 + $0x100] sm:$0xff]  ;;  %v524_v2 = vld [vmem:[#allocation5 + $0x110] sm:$0xff] }
 0x15d   :  { %923 = vmatpush1.bf16.msra.mxu0 %v922_v45  ;;  %v580_v45 = vld [vmem:[#allocation5 + $0x2d0] sm:$0xff] }
 0x15e   :  { %925 = vmatprep.subr.bf16.mxu0 %v924_v50  ;;  %v942_v50 = vpack.c.bf16 %v516_v42, %v514_v41  ;;  %v1006_v51 = vpack.c.bf16 %v580_v45, %v578_v43  ;;  %v534_v41 = vld [vmem:[#allocation5 + $0x160] sm:$0xff]  ;;  %v536_v42 = vld [vmem:[#allocation5 + $0x170] sm:$0xff] }
 0x15f   :  { %v598_v43 = vld [vmem:[#allocation5 + $0x360] sm:$0xff]  ;;  %v600_v45 = vld [vmem:[#allocation5 + $0x370] sm:$0xff] }
 0x161   :  { %927 = vmatpush1.bf16.msra.mxu0 %v926_v58  ;;  %v523_v58 = vld [vmem:[#allocation5 + $0x108] sm:$0xff] }
 0x162   :  { %929 = vmatprep.subr.bf16.mxu0 %v928_v63  ;;  %v1010_v63 = vpack.c.bf16 %v584_v57, %v582_v55  ;;  %v948_v0 = vpack.c.bf16 %v525_v59, %v523_v58  ;;  %v602_v55 = vld [vmem:[#allocation5 + $0x380] sm:$0xff]  ;;  %v604_v57 = vld [vmem:[#allocation5 + $0x390] sm:$0xff]  ;;  %v543_v58 = vld [vmem:[#allocation5 + $0x1a8] sm:$0xff] }
 0x163   :  { %v545_v59 = vld [vmem:[#allocation5 + $0x1b8] sm:$0xff] }
 0x165   :  { %931 = vmatpush1.bf16.msra.mxu0 %v930_v10  ;;  %v950_v10 = vpack.c.bf16 %v524_v2, %v522_v1 }
 0x22b   :  { %v1245_v11 = vpop.f32.mrb[2].mxu0 }
 0x22c   :  { %v1247_v12 = vpop.f32.mrb[3].mxu0  ;;  %v430_v13 = vmul.f32 %v1245_v11, %v1245_v11 }
 0x22d   :  { %v423_v14 = vadd.f32 %v1247_v12, %v1245_v11  ;;  %v431_v15 = vmul.f32 %v1247_v12, %v1247_v12 }
 0x22f   :  { %424 = vadd.xlane.f32.xlu0 %v423_v14  ;;  %v1255_v16 = vpop.f32.mrb[4].mxu0  ;;  %v434_v17 = vadd.f32 %v431_v15, %v430_v13  ;;  %v994_v13 = vpack.c.bf16 %v568_v5, %v566_v4  ;;  %v932_v14 = vpack.c.bf16 %v509_v7, %v507_v6  ;;  %v506_v15 = vld [vmem:[#allocation5 + $0x80] sm:$0xff]  ;;  %v1012_v4 = vpack.c.bf16 %v589_v61, %v587_v60  ;;  %v588_v5 = vld [vmem:[#allocation5 + $0x310] sm:$0xff]  ;;  %v527_v6 = vld [vmem:[#allocation5 + $0x128] sm:$0xff] }
 0x230   :  { %v1257_v18 = vpop.f32.mrb[5].mxu0  ;;  %v432_v19 = vmul.f32 %v1255_v16, %v1255_v16  ;;  %v529_v7 = vld [vmem:[#allocation5 + $0x138] sm:$0xff]  ;;  %v607_v60 = vld [vmem:[#allocation5 + $0x3a8] sm:$0xff] }
 0x231   :  { %435 = vadd.xlane.f32.xlu1 %v434_v17  ;;  %v426_v20 = vadd.f32 %v1257_v18, %v1255_v16  ;;  %v433_v21 = vmul.f32 %v1257_v18, %v1257_v18  ;;  %v508_v17 = vld [vmem:[#allocation5 + $0x90] sm:$0xff]  ;;  %995 = vmatpush1.bf16.msra.mxu1 %v994_v13  ;;  %v1014_v13 = vpack.c.bf16 %v588_v5, %v586_v3  ;;  %v609_v61 = vld [vmem:[#allocation5 + $0x3b8] sm:$0xff] }
 0x232   :  { %v934_v26 = vpack.c.bf16 %v508_v17, %v506_v15  ;;  %933 = vmatprep.subr.bf16.mxu0 %v932_v14  ;;  %v952_v14 = vpack.c.bf16 %v529_v7, %v527_v6  ;;  %v526_v15 = vld [vmem:[#allocation5 + $0x120] sm:$0xff]  ;;  %v528_v17 = vld [vmem:[#allocation5 + $0x130] sm:$0xff]  ;;  %v1032_v1 = vpack.c.bf16 %v609_v61, %v607_v60 }
 0x233   :  { %427 = vadd.xlane.f32.xlu0 %v426_v20  ;;  %v437_v22 = vadd.f32 %v433_v21, %v432_v19  ;;  %v570_v19 = vld [vmem:[#allocation5 + $0x280] sm:$0xff]  ;;  %v996_v20 = vpack.c.bf16 %v573_v9, %v571_v8  ;;  %v572_v21 = vld [vmem:[#allocation5 + $0x290] sm:$0xff]  ;;  %v591_v8 = vld [vmem:[#allocation5 + $0x328] sm:$0xff] }
 0x234   :  { %v998_v27 = vpack.c.bf16 %v572_v21, %v570_v19  ;;  %935 = vmatpush1.bf16.msra.mxu0 %v934_v26  ;;  %v593_v9 = vld [vmem:[#allocation5 + $0x338] sm:$0xff]  ;;  %v590_v19 = vld [vmem:[#allocation5 + $0x320] sm:$0xff]  ;;  %v592_v21 = vld [vmem:[#allocation5 + $0x330] sm:$0xff]  ;;  %v954_v26 = vpack.c.bf16 %v528_v17, %v526_v15 }
 0x235   :  { %438 = vadd.xlane.f32.xlu1 %v437_v22  ;;  %v511_v22 = vld [vmem:[#allocation5 + $0xa8] sm:$0xff]  ;;  %997 = vmatprep.subr.bf16.mxu1 %v996_v20  ;;  %v1016_v20 = vpack.c.bf16 %v593_v9, %v591_v8  ;;  %v445_v15 = vld [vmem:[%s1291_s4] sm:$0xff]  ;;  %s1167_s4 = smov [#allocation8]  }
 0x236   :  { %v936_v28 = vpack.c.bf16 %v513_v23, %v511_v22  ;;  %999 = vmatpush1.bf16.msra.mxu1 %v998_v27  ;;  %v531_v22 = vld [vmem:[#allocation5 + $0x148] sm:$0xff]  ;;  %v533_v23 = vld [vmem:[#allocation5 + $0x158] sm:$0xff]  ;;  %v1018_v27 = vpack.c.bf16 %v592_v21, %v590_v19  ;;  %v542_v19 = vld [vmem:[#allocation5 + $0x1a0] sm:$0xff] }
 0x237   :  { %1001 = vmatprep.subr.bf16.mxu1 %v1000_v32  ;;  %v1020_v32 = vpack.c.bf16 %v597_v25, %v595_v24  ;;  %v606_v21 = vld [vmem:[#allocation5 + $0x3a0] sm:$0xff]  ;;  %v608_v24 = vld [vmem:[#allocation5 + $0x3b0] sm:$0xff] }
 0x238   :  { %937 = vmatprep.subr.bf16.mxu0 %v936_v28  ;;  %v956_v28 = vpack.c.bf16 %v533_v23, %v531_v22  ;;  %v449_v25 = vld [vmem:[%s1292_s5] sm:$0xff]  ;;  %s768_s5 = sshll.u32 %s1167_s4, 4  ;;  %s769_s5 = int_to_ptr.vmem [resolvable:$true] %s768_s5 }
 0x239   :  { %939 = vmatpush1.bf16.msra.mxu0 %v938_v38  ;;  %v958_v38 = vpack.c.bf16 %v532_v30, %v530_v29  ;;  %v549_v29 = vld [vmem:[#allocation5 + $0x1d8] sm:$0xff]  ;;  %v611_v30 = vld [vmem:[#allocation5 + $0x3c8] sm:$0xff]  ;;  %s1128_s19 = scalar_lea.vmem %s769_s5, 256  ;;  %p1133_p11 = scmp.lt.s32.totalorder %s769_s5, %s769_s5 }
 0x23a   :  { %1003 = vmatpush1.bf16.msra.mxu1 %v1002_v39  ;;  %941 = vmatprep.subr.bf16.mxu0 %v940_v40  ;;  %v1022_v39 = vpack.c.bf16 %v596_v33, %v594_v31  ;;  %v960_v40 = vpack.c.bf16 %v537_v35, %v535_v34  ;;  %v546_v33 = vld [vmem:[#allocation5 + $0x1c0] sm:$0xff]  ;;  %v548_v34 = vld [vmem:[#allocation5 + $0x1d0] sm:$0xff]  ;;  %p1129_p10 = scmp.ne.s32.totalorder %s769_s5, %s1128_s19  ;;  %p1134_p12 = scmp.lt.s32.totalorder %s1128_s19, %s1128_s19 }
 0x23b   :  { %1005 = vmatprep.subr.bf16.mxu1 %v1004_v44  ;;  %v1024_v44 = vpack.c.bf16 %v601_v37, %v599_v36  ;;  %v974_v37 = vpack.c.bf16 %v548_v34, %v546_v33 }
 0x23c   :  { %p1135_p13 = por %p1134_p12, %p1133_p11 }
 0x23d   :  { %943 = vmatpush1.bf16.msra.mxu0 %v942_v50  ;;  %v962_v50 = vpack.c.bf16 %v536_v42, %v534_v41  ;;  %v551_v41 = vld [vmem:[#allocation5 + $0x1e8] sm:$0xff]  ;;  %v553_v42 = vld [vmem:[#allocation5 + $0x1f8] sm:$0xff] }
 0x23e   :  { %1007 = vmatpush1.bf16.msra.mxu1 %v1006_v51  ;;  %945 = vmatprep.subr.bf16.mxu0 %v944_v52  ;;  %v1026_v51 = vpack.c.bf16 %v600_v45, %v598_v43  ;;  %v964_v52 = vpack.c.bf16 %v541_v47, %v539_v46  ;;  %v615_v43 = vld [vmem:[#allocation5 + $0x3e8] sm:$0xff]  ;;  %v617_v45 = vld [vmem:[#allocation5 + $0x3f8] sm:$0xff]  ;;  %v550_v46 = vld [vmem:[#allocation5 + $0x1e0] sm:$0xff]  ;;  %p1136_p0 = pnand %p1135_p13, %p1129_p10 }
 0x23f   :  { %1009 = vmatprep.subr.bf16.mxu1 %v1008_v56  ;;  %v1028_v56 = vpack.c.bf16 %v605_v49, %v603_v48  ;;  %v552_v47 = vld [vmem:[#allocation5 + $0x1f0] sm:$0xff]  ;;  %v1040_v48 = vpack.c.bf16 %v617_v45, %v615_v43 }
 0x240   :  { %v978_v49 = vpack.c.bf16 %v552_v47, %v550_v46 }
 0x241   :  { %947 = vmatpush1.bf16.msra.mxu0 %v946_v62  ;;  %v966_v62 = vpack.c.bf16 %v540_v54, %v538_v53 }
 0x242   :  { %1011 = vmatpush1.bf16.msra.mxu1 %v1010_v63  ;;  %949 = vmatprep.subr.bf16.mxu0 %v948_v0  ;;  %v1030_v63 = vpack.c.bf16 %v604_v57, %v602_v55  ;;  %v968_v0 = vpack.c.bf16 %v545_v59, %v543_v58 }
 0x243   :  { %1013 = vmatprep.subr.bf16.mxu1 %v1012_v4 }
 0x245   :  { %951 = vmatpush1.bf16.msra.mxu0 %v950_v10 }
 0x246   :  { %1015 = vmatpush1.bf16.msra.mxu1 %v1014_v13  ;;  %953 = vmatprep.subr.bf16.mxu0 %v952_v14 }
 0x247   :  { %1017 = vmatprep.subr.bf16.mxu1 %v1016_v20  ;;  %v544_v20 = vld [vmem:[#allocation5 + $0x1b0] sm:$0xff] }
 0x248   :  { %v970_v23 = vpack.c.bf16 %v544_v20, %v542_v19 }
 0x249   :  { %955 = vmatpush1.bf16.msra.mxu0 %v954_v26  ;;  %v1034_v26 = vpack.c.bf16 %v608_v24, %v606_v21 }
 0x24a   :  { %1019 = vmatpush1.bf16.msra.mxu1 %v1018_v27  ;;  %957 = vmatprep.subr.bf16.mxu0 %v956_v28  ;;  %v547_v28 = vld [vmem:[#allocation5 + $0x1c8] sm:$0xff] }
 0x24b   :  { %1021 = vmatprep.subr.bf16.mxu1 %v1020_v32  ;;  %v972_v31 = vpack.c.bf16 %v549_v29, %v547_v28  ;;  %v613_v32 = vld [vmem:[#allocation5 + $0x3d8] sm:$0xff] }
 0x24c   :  { %v1036_v36 = vpack.c.bf16 %v613_v32, %v611_v30 }
 0x24d   :  { %959 = vmatpush1.bf16.msra.mxu0 %v958_v38  ;;  %v610_v38 = vld [vmem:[#allocation5 + $0x3c0] sm:$0xff] }
 0x24e   :  { %1023 = vmatpush1.bf16.msra.mxu1 %v1022_v39  ;;  %961 = vmatprep.subr.bf16.mxu0 %v960_v40  ;;  %v612_v39 = vld [vmem:[#allocation5 + $0x3d0] sm:$0xff] }
 0x24f   :  { %1025 = vmatprep.subr.bf16.mxu1 %v1024_v44  ;;  %v1038_v40 = vpack.c.bf16 %v612_v39, %v610_v38  ;;  %v976_v44 = vpack.c.bf16 %v553_v42, %v551_v41 }
 0x251   :  { %963 = vmatpush1.bf16.msra.mxu0 %v962_v50  ;;  %v614_v50 = vld [vmem:[#allocation5 + $0x3e0] sm:$0xff] }
 0x252   :  { %1027 = vmatpush1.bf16.msra.mxu1 %v1026_v51  ;;  %965 = vmatprep.subr.bf16.mxu0 %v964_v52  ;;  %v616_v51 = vld [vmem:[#allocation5 + $0x3f0] sm:$0xff] }
 0x253   :  { %1029 = vmatprep.subr.bf16.mxu1 %v1028_v56  ;;  %v1042_v52 = vpack.c.bf16 %v616_v51, %v614_v50 }
 0x255   :  { %967 = vmatpush1.bf16.msra.mxu0 %v966_v62 }
 0x256   :  { %1031 = vmatpush1.bf16.msra.mxu1 %v1030_v63  ;;  %969 = vmatprep.subr.bf16.mxu0 %v968_v0 }
 0x257   :  { %1033 = vmatprep.subr.bf16.mxu1 %v1032_v1 }
 0x259   :  { %971 = vmatpush1.bf16.msra.mxu0 %v970_v23 }
 0x25a   :  { %1035 = vmatpush1.bf16.msra.mxu1 %v1034_v26  ;;  %973 = vmatprep.subr.bf16.mxu0 %v972_v31 }
 0x25b   :  { %1037 = vmatprep.subr.bf16.mxu1 %v1036_v36 }
 0x25d   :  { %975 = vmatpush1.bf16.msra.mxu0 %v974_v37 }
 0x25e   :  { %1039 = vmatpush1.bf16.msra.mxu1 %v1038_v40  ;;  %977 = vmatprep.subr.bf16.mxu0 %v976_v44 }
 0x25f   :  { %1041 = vmatprep.subr.bf16.mxu1 %v1040_v48 }
 0x261   :  { %979 = vmatpush1.bf16.msra.mxu0 %v978_v49 }
 0x262   :  { %1043 = vmatpush1.bf16.msra.mxu1 %v1042_v52 }
 0x2bc   :  { %v425_v2 = vpop.xlane.xlu0 %424 }
 0x2be   :  { %v436_v3 = vpop.xlane.xlu1 %435 }
 0x2c0   :  { %v428_v4 = vpop.xlane.xlu0 %427 }
 0x2c1   :  { %v429_v5 = vadd.f32 %v428_v4, %v425_v2 }
 0x2c2   :  { %v439_v6 = vpop.xlane.xlu1 %438 }
 0x2c3   :  { %v441_v7 = vmul.f32 0.001953125, %v429_v5  ;;  %v440_v8 = vadd.f32 %v439_v6, %v436_v3 }
 0x2c5   :  { %v443_v9 = vmul.f32 %v441_v7, %v441_v7  ;;  %v442_v10 = vmul.f32 0.001953125, %v440_v8 }
 0x2c7   :  { %v444_v13 = vsub.f32 %v442_v10, %v443_v9 }
 0x2c9   :  { %v446_v14 = vadd.f32 1e-05, %v444_v13 }
 0x2cb   :  { %1060 = vrsqrt.f32 %v446_v14 }
 0x2d5   :  { %v1061_v17 = vpop.eup %1060 }
 0x2d6   :  { %v448_v22 = vmul.f32 %v1061_v17, %v445_v15 }
 0x2d8   :  { %454 = vperm.xlu0 %1058, %v448_v22   ;;  %v450_v27 = vmul.f32 %v448_v22, %v441_v7 }
 0x2da   :  { %v451_v35 = vsub.f32 %v449_v25, %v450_v27 }
 0x2dc   :  { %463 = vperm.xlu1 %1059, %v451_v35  }
 0x357   :  { %v455_v53 = vpop.permute.xlu0 %454 }
 0x358   :  { %v457_v54 = vmul.f32 %v455_v53, %v1245_v11  ;;  %v458_v55 = vmul.f32 %v455_v53, %v1247_v12  ;;  %v459_v56 = vmul.f32 %v455_v53, %v1255_v16  ;;  %v460_v57 = vmul.f32 %v455_v53, %v1257_v18 }
 0x35b   :  { %v464_v58 = vpop.permute.xlu1 %463 }
 0x35c   :  { %v466_v59 = vadd.f32 %v464_v58, %v457_v54  ;;  %v467_v60 = vadd.f32 %v464_v58, %v458_v55  ;;  %v468_v61 = vadd.f32 %v464_v58, %v459_v56  ;;  %v469_v62 = vadd.f32 %v464_v58, %v460_v57 }
 0x35e   :  { %v470_v63 = vmax.f32 %v466_v59, 0.0  ;;  %v471_v0 = vmax.f32 %v467_v60, 0.0  ;;  %v472_v1 = vmax.f32 %v468_v61, 0.0  ;;  %v473_v2 = vmax.f32 %v469_v62, 0.0 }
 0x360   :  { %v780_v3 = vcombine.low %v470_v63, %v472_v1  ;;  %v782_v4 = vcombine.high %v470_v63, %v472_v1  ;;  %v781_v5 = vcombine.low %v471_v0, %v473_v2  ;;  %v783_v6 = vcombine.high %v471_v0, %v473_v2 }
 0x362   :  { %682 = vmatprep.mubr.f32.mxu0 %v781_v5  ;;  %753 = vmatprep.mubr.f32.mxu1 %v783_v6 }
 0x363   :  { %683 = vmatmul.mubr.f32.vlgmr.msra.gmra.mrb[6].mxu0 %v780_v3  ;;  %754 = vmatmul.mubr.f32.vlgmr.msra.gmra.mrb[2].mxu1 %v782_v4 }
 0x436   :  { %v684_v11 = vpop.f32.mrb[6].mxu0  ;;  %v755_v12 = vpop.f32.mrb[2].mxu1 }
 0x437   :  { %v756_v16 = vadd.f32 %v755_v12, %v684_v11  ;;  %v686_v18 = vpop.f32.mrb[7].mxu0  ;;  %v757_v7 = vpop.f32.mrb[3].mxu1 }
 0x438   :  { %v758_v8 = vadd.f32 %v757_v7, %v686_v18 }
 0x439   :  { %760 = vst [vmem:[#allocation8] sm:$0xff] %v756_v16 }
 0x43a   :  { %761 = vst [vmem:[#allocation8 + $0x8] sm:$0xff] %v758_v8 }
 0x43b   :  { %1139 = shalt.err (!%p1136_p0)
}
 0x43c   :  { %s1140_s21 = scalar_lea.hbm %s1293_s6, 256 }
 0x43d   :  { %p1141_p1 = scmp.ne.s32.totalorder %s1293_s6, %s1140_s21  ;;  %p1144_p2 = scmp.lt.u32.totalorder %s1140_s21, %s1293_s6 }
 0x43f   :  { %p1146_p3 = pnand %p1144_p2, %p1141_p1 }
 0x441   :  { %1149 = shalt.err (!%p1146_p3)
}
 0x442   :  { %771 = dma.vmem_to_hbm [thread:$0]  %s769_s5, 256, %s1293_s6, [#allocation4]  }
 0x443   :  { %1154 = dma.done.wait [#allocation4], 256  }
 0x444   :  { %1155 = vsyncadd [#allocation4], 4294967040 }
 0x445   :  { %775 = vsyncpa [#allocation3], 1 }
 0x446   :  { %776 = vsyncpa [#allocation6], 1 }
 0x447   :  { %777 = vsyncpa [#allocation4], 1 }

</bundles_post_ra>
